<compile_context>
chip_gen: v7x
topology: tpu7x:2x2x1
jax: 0.10.0
libtpu: 0.0.40
codegen_flags: <defaults>
</compile_context>

<pallas_src>
import jax
import jax.numpy as jnp
from jax.experimental import pallas as pl
from jax.experimental.pallas import tpu as pltpu


def snake_kernel(x_ref, a_ref, o_ref):
    # x_ref: (TM, LW) tile; a_ref: (1, LW) resident parameter row.
    x = x_ref[...]
    a_row = a_ref[...]                    # (1, LW)
    inv_a = 1.0 / a_row                   # exact reciprocal, once per tile row
    s = jnp.sin(x * a_row)                # broadcast over rows (EUP sin)
    o_ref[...] = x + (s * s) * inv_a      # x + (1/a) * sin^2(a*x)


def _choose_lane_fold(n_rows, feat):
    """Largest k (<= ceil(128/feat)) dividing n_rows; prefer (k*feat) % 128 == 0."""
    if feat >= 128:
        return 1
    target = pl.cdiv(128, feat)
    for cand in range(target, 0, -1):
        if n_rows % cand == 0 and (cand * feat) % 128 == 0:
            return cand
    for cand in range(target, 0, -1):
        if n_rows % cand == 0:
            return cand
    return 1


def snake(x, a, *, max_rows_per_tile=None):
    """Snake activation.

    x: (..., F) float array, a: (F,) per-feature trainable parameter.
    Returns an array with the same shape/dtype as x.
    """
    orig_shape = x.shape
    F = a.shape[-1]
    assert orig_shape[-1] == F, "trailing dim of x must match a"

    x2d = x.reshape(-1, F)                       # row-major (N, F) slab (free reshape)
    N = x2d.shape[0]

    # Fold rows into lanes when F < 128 so stores are lane-dense / unmasked.
    k = _choose_lane_fold(N, F)
    rows = N // k
    lane_w = k * F
    x2d = x2d.reshape(rows, lane_w)              # still a row-major bitcast reshape
    a_row = jnp.tile(a.reshape(1, F), (1, k)).astype(x.dtype)   # (1, lane_w)

    # Row-tile size: ~2 MiB per x tile (double-buffered x + out ~= 8 MiB VMEM).
    itemsize = jnp.dtype(x.dtype).itemsize
    if max_rows_per_tile is None:
        budget_bytes = 2 * 1024 * 1024
        max_rows_per_tile = max(8, (budget_bytes // (lane_w * itemsize)) // 8 * 8)
    else:
        max_rows_per_tile = max(8, (max_rows_per_tile // 8) * 8)
    tm_eff = rows if rows <= max_rows_per_tile else max_rows_per_tile
    grid = (pl.cdiv(rows, tm_eff),)

    out2d = pl.pallas_call(
        snake_kernel,
        out_shape=jax.ShapeDtypeStruct((rows, lane_w), x.dtype),
        grid_spec=pltpu.PrefetchScalarGridSpec(
            num_scalar_prefetch=0,
            grid=grid,
            in_specs=[
                pl.BlockSpec((tm_eff, lane_w), lambda i: (i, 0)),  # x tile
                pl.BlockSpec((1, lane_w), lambda i: (0, 0)),       # `a` resident in VMEM
            ],
            out_specs=pl.BlockSpec((tm_eff, lane_w), lambda i: (i, 0)),
        ),
        compiler_params=pltpu.CompilerParams(
            dimension_semantics=("parallel",),
        ),
    )(x2d, a_row)

    return out2d.reshape(orig_shape)


def snake_ref(x, a):
    # Pure-JAX reference matching the PyTorch forward exactly.
    return x + 1.0 / a * jnp.power(jnp.sin(x * a), 2)


if __name__ == "__main__":
    key = jax.random.PRNGKey(0)
    ka1, kx1, ka2, kx2 = jax.random.split(key, 4)

    # --- case 1: small, F < 128 (exercises lane folding), single tile ---
    # Mirrors Snake(in_features=32) applied to a (batch=2, seq=8, hidden=32) input.
    F1 = 32
    a1 = jax.random.exponential(ka1, (F1,), dtype=jnp.float32) / 0.1  # Exponential(0.1) init
    x1 = jax.random.normal(kx1, (2, 8, F1), dtype=jnp.float32)
    out1 = jax.block_until_ready(snake(x1, a1))
    ref1 = snake_ref(x1, a1)
    assert out1.shape == x1.shape and out1.dtype == x1.dtype
    assert jnp.allclose(out1, ref1, atol=1e-5, rtol=1e-5)

    # --- case 2: multi-tile with a partial last tile (forced small row tile) ---
    F2 = 64
    a2 = jax.random.exponential(ka2, (F2,), dtype=jnp.float32) / 0.1
    x2 = jax.random.normal(kx2, (100, 3, F2), dtype=jnp.float32)       # N=300 rows
    out2 = jax.block_until_ready(snake(x2, a2, max_rows_per_tile=64))  # 3 grid steps, partial last
    ref2 = snake_ref(x2, a2)
    assert out2.shape == x2.shape and out2.dtype == x2.dtype
    assert jnp.allclose(out2, ref2, atol=1e-5, rtol=1e-5)

    print("KERNEL_OK")
</pallas_src>

<mosaic_0001>
module attributes {stable_mosaic.version = 11 : i64} {
  func.func @snake_kernel(%arg0: i32, %arg1: memref<4x128xf32, #tpu.memory_space<vmem>>, %arg2: memref<1x128xf32, #tpu.memory_space<vmem>>, %arg3: memref<4x128xf32, #tpu.memory_space<vmem>>) attributes {dimension_semantics = [#tpu.dimension_semantics<parallel>], iteration_bounds = array<i64: 1>, scalar_prefetch = 0 : i64, scratch_operands = 0 : i64, tpu.core_type = #tpu.core_type<tc>, window_params = [{transform_indices = @transform_0, window_bounds = array<i64: 4, 128>}, {pipeline_mode = #tpu.pipeline_mode<synchronous>, transform_indices = @transform_1, window_bounds = array<i64: 1, 128>}, {transform_indices = @transform_2, window_bounds = array<i64: 4, 128>}]} {
    %c0 = arith.constant 0 : index
    %c0_0 = arith.constant 0 : index
    %0 = vector.load %arg1[%c0, %c0_0] : memref<4x128xf32, #tpu.memory_space<vmem>>, vector<4x128xf32>
    %c0_1 = arith.constant 0 : index
    %c0_2 = arith.constant 0 : index
    %1 = vector.load %arg2[%c0_1, %c0_2] : memref<1x128xf32, #tpu.memory_space<vmem>>, vector<1x128xf32>
    %cst = arith.constant 1.000000e+00 : f32
    %2 = vector.broadcast %cst : f32 to vector<1x128xf32>
    %3 = arith.divf %2, %1 : vector<1x128xf32>
    %4 = vector.broadcast %1 : vector<1x128xf32> to vector<4x128xf32>
    %5 = arith.mulf %0, %4 : vector<4x128xf32>
    %6 = math.sin %5 : vector<4x128xf32>
    %7 = arith.mulf %6, %6 : vector<4x128xf32>
    %8 = vector.broadcast %3 : vector<1x128xf32> to vector<4x128xf32>
    %9 = arith.mulf %7, %8 : vector<4x128xf32>
    %10 = arith.addf %0, %9 : vector<4x128xf32>
    %c0_3 = arith.constant 0 : index
    %c0_4 = arith.constant 0 : index
    %11 = vector.load %arg3[%c0_3, %c0_4] : memref<4x128xf32, #tpu.memory_space<vmem>>, vector<4x128xf32>
    tpu.vector_store %arg3[%c0_3, %c0_4], %10 {strides = array<i32>} : memref<4x128xf32, #tpu.memory_space<vmem>>, vector<4x128xf32>,
    return
  }
  func.func @transform_0(%arg0: i32) -> (i32, i32) {
    %c0_i32 = arith.constant 0 : i32
    %c0_i32_0 = arith.constant 0 : i32
    return %arg0, %c0_i32 : i32, i32
  }
  func.func @transform_1(%arg0: i32) -> (i32, i32) {
    %c0_i32 = arith.constant 0 : i32
    %c0_i32_0 = arith.constant 0 : i32
    %c0_i32_1 = arith.constant 0 : i32
    return %c0_i32, %c0_i32_0 : i32, i32
  }
  func.func @transform_2(%arg0: i32) -> (i32, i32) {
    %c0_i32 = arith.constant 0 : i32
    %c0_i32_0 = arith.constant 0 : i32
    return %arg0, %c0_i32 : i32, i32
  }
}

</mosaic_0001>

<bundles_post_ra>
// kernel: tpu_custom_call.1
= control target key start
LH: loop header
LB: loop body
LE: loop exit
PB: predicated region body
PF: predicated region fallthrough
CT: control target
= control target key end

     0   :  { %7 = vsyncpa [#allocation3], 0  ;;  %s312_s0 = inlined_call_operand.hbm [shape: f32[4,128], index: 0, kind: input, shape index: {}]   ;;  %s313_s1 = inlined_call_operand.vmem [shape: f32[1,128], index: 1, kind: input, shape index: {}]   ;;  %s314_s2 = inlined_call_operand.hbm [shape: f32[4,128], index: 2, kind: output, shape index: {}]  }
   0x1   :  { %8 = vsyncpa [#allocation4], 0  ;;  %s234_s9 = smov [#allocation2]   ;;  %s186_s13 = scalar_lea.hbm %s312_s0, 64 }
   0x2   :  { %s15_s10 = sshll.u32 %s234_s9, 4  ;;  %p187_p0 = scmp.ne.s32.totalorder %s312_s0, %s186_s13  ;;  %s16_s10 = int_to_ptr.vmem [resolvable:$true] %s15_s10 }
   0x3   :  { %p190_p1 = scmp.lt.u32.totalorder %s186_s13, %s312_s0 }
   0x5   :  { %p192_p2 = pnand %p190_p1, %p187_p0 }
   0x7   :  { %195 = shalt.err (!%p192_p2)
}
   0x8   :  { %s196_s18 = scalar_lea.vmem %s16_s10, 64  ;;  %p201_p4 = scmp.lt.s32.totalorder %s16_s10, %s16_s10 }
   0x9   :  { %p197_p3 = scmp.ne.s32.totalorder %s16_s10, %s196_s18  ;;  %p202_p5 = scmp.lt.s32.totalorder %s196_s18, %s196_s18 }
   0xb   :  { %p203_p6 = por %p202_p5, %p201_p4 }
   0xd   :  { %p204_p7 = pnand %p203_p6, %p197_p3 }
   0xf   :  { %207 = shalt.err (!%p204_p7)
}
  0x10   :  { %18 = dma.hbm_to_vmem [thread:$0]  %s312_s0, 64, %s16_s10, [#allocation3]  }
  0x11   :  { %230 = dma.done.wait [#allocation3], 64  }
  0x12   :  { %231 = vsyncadd [#allocation3], 4294967232  ;;  %v29_v0 = vlaneseq  ;;  %v269_v3 = vld [vmem:[#allocation2] sm:$0xf]  ;;  %v235_v20 = vmov 683565275  }
  0x13   :  { %v25_v4 = vld [vmem:[%s313_s1] sm:$0x1]  ;;  %v236_v22 = vmov 2475754826   ;;  %v237_v24 = vmov 2131351028  }
  0x14   :  { %v30_v1 = vshrl.u32 %v29_v0, 7  ;;  %180 = vrcp.f32 %v25_v4  ;;  %v238_v26 = vmov 2102212464   ;;  %v239_v28 = vmov 920167782   ;;  %s241_s0 = smov [#allocation5]  }
  0x15   :  { %v240_v35 = vmov 1326507024   ;;  %s155_s1 = sshll.u32 %s241_s0, 4  ;;  %s156_s1 = int_to_ptr.vmem [resolvable:$true] %s155_s1 }
  0x16   :  { %v31_v2 = vsub.s32 0, %v30_v1  ;;  %s208_s23 = scalar_lea.vmem %s156_s1, 64  ;;  %p213_p9 = scmp.lt.s32.totalorder %s156_s1, %s156_s1 }
  0x17   :  { %p209_p8 = scmp.ne.s32.totalorder %s156_s1, %s208_s23  ;;  %p214_p10 = scmp.lt.s32.totalorder %s208_s23, %s208_s23 }
  0x18   :  { %v32_v5 = vrot.slane %v25_v4, %v31_v2 }
  0x19   :  { %p215_p11 = por %p214_p10, %p213_p9 }
  0x1a   :  { %v275_v6 = vmul.f32 %v32_v5, %v269_v3 }
  0x1b   :  { %p216_p12 = pnand %p215_p11, %p209_p8 }
  0x1c   :  { %v38_v7 = vand.u32 2139095040, %v275_v6  ;;  %v35_v9 = vand.u32 2147483647, %v275_v6  ;;  %vm37_vm7 = vcmp.lt.s32.totalorder %v275_v6, 0  ;;  %vm127_vm12 = vweird.f32 %v275_v6 }
  0x1e   :  { %v39_v8 = vshrl.u32 %v38_v7, 23  ;;  %v181_v11 = vpop.eup %180  ;;  %v42_v13 = vand.u32 8388607, %v35_v9  ;;  %vm36_vm8 = vcmp.le.f32.partialorder %v35_v9, 0.7853982 }
  0x1f   :  { %v281_v14 = vrot.slane %v181_v11, %v31_v2 }
  0x20   :  { %v164_v10 = vadd.s32 4294967169, %v39_v8  ;;  %v43_v17 = vor.u32 8388608, %v42_v13 }
  0x22   :  { %v45_v12 = vadd.s32 1, %v164_v10  ;;  %v83_v37 = vshll.u32 %v43_v17, 8 }
  0x24   :  { %vm46_vm0 = vcmp.gt.s32.totalorder %v45_v12, 0 }
  0x25   :  { %v47_v15 = vsel %vm46_vm0, %v45_v12, 0 }
  0x26   :  { %v49_v16 = vand.u32 31, %v47_v15  ;;  %v48_v18 = vshrl.u32 %v47_v15, 5 }
  0x28   :  { %v50_v19 = vsub.s32 32, %v49_v16  ;;  %v52_v21 = vshll.u32 %v235_v20, %v49_v16  ;;  %v55_v23 = vshll.u32 %v236_v22, %v49_v16  ;;  %v58_v25 = vshll.u32 %v237_v24, %v49_v16 }
  0x29   :  { %v61_v27 = vshll.u32 %v238_v26, %v49_v16  ;;  %v64_v29 = vshll.u32 %v239_v28, %v49_v16  ;;  %vm67_vm1 = vcmp.lt.s32.totalorder %v48_v18, 1  ;;  %vm70_vm2 = vcmp.lt.s32.totalorder %v48_v18, 4 }
  0x2a   :  { %v51_v30 = vshrl.u32 %v235_v20, %v50_v19  ;;  %v53_v31 = vshrl.u32 %v236_v22, %v50_v19  ;;  %v56_v32 = vshrl.u32 %v237_v24, %v50_v19  ;;  %v59_v33 = vshrl.u32 %v238_v26, %v50_v19 }
  0x2b   :  { %v62_v34 = vshrl.u32 %v239_v28, %v50_v19  ;;  %v65_v36 = vshrl.u32 %v240_v35, %v50_v19  ;;  %vm68_vm3 = vcmp.lt.s32.totalorder %v48_v18, 2  ;;  %vm69_vm4 = vcmp.lt.s32.totalorder %v48_v18, 3 }
  0x2c   :  { %v54_v38 = vor.u32 %v53_v31, %v52_v21  ;;  %v57_v39 = vor.u32 %v56_v32, %v55_v23  ;;  %v60_v40 = vor.u32 %v59_v33, %v58_v25 }
  0x2d   :  { %v63_v41 = vor.u32 %v62_v34, %v61_v27  ;;  %v66_v42 = vor.u32 %v65_v36, %v64_v29 }
  0x2e   :  { %v71_v43 = vsel %vm67_vm1, %v51_v30, %v54_v38  ;;  %v72_v44 = vsel %vm70_vm2, %v60_v40, 2102212464  ;;  %v75_v45 = vsel %vm67_vm1, %v54_v38, %v57_v39  ;;  %v79_v46 = vsel %vm67_vm1, %v57_v39, %v60_v40 }
  0x2f   :  { %v73_v47 = vsel %vm69_vm4, %v57_v39, %v72_v44  ;;  %v76_v48 = vsel %vm70_vm2, %v63_v41, 920167782  ;;  %v80_v49 = vsel %vm70_vm2, %v66_v42, 1326507024 }
  0x30   :  { %v77_v50 = vsel %vm69_vm4, %v60_v40, %v76_v48  ;;  %v81_v51 = vsel %vm69_vm4, %v63_v41, %v80_v49  ;;  %v74_v52 = vsel %vm68_vm3, %v71_v43, %v73_v47 }
  0x31   :  { %v78_v53 = vsel %vm68_vm3, %v75_v45, %v77_v50  ;;  %v82_v54 = vsel %vm68_vm3, %v79_v46, %v81_v51  ;;  %v90_v59 = vmul.u32 %v83_v37, %v74_v52 }
  0x32   :  { %v283_v55 = vmul.u32.u64.low %v83_v37, %v82_v54  ;;  %v284_v56 = vmul.u32.u64.high %v83_v37, %v82_v54, %v283_v55  ;;  %v286_v57 = vmul.u32.u64.low %v83_v37, %v78_v53  ;;  %v287_v58 = vmul.u32.u64.high %v83_v37, %v78_v53, %v286_v57 }
  0x34   :  { %vm92_vm5 = vc.u32 %v284_v56, %v286_v57  ;;  %v93_v60 = vadd.s32 1, %v287_v58  ;;  %v91_v10 = vadd.s32 %v286_v57, %v284_v56 }
  0x36   :  { %v94_v61 = vsel %vm92_vm5, %v93_v60, %v287_v58 }
  0x37   :  { %v95_v62 = vadd.s32 %v94_v61, %v90_v59 }
  0x39   :  { %v96_v63 = vadd.s32 536870912, %v95_v62 }
  0x3b   :  { %v97_v0 = vshrl.u32 %v96_v63, 30 }
  0x3d   :  { %v98_v1 = vshll.u32 %v97_v0, 30  ;;  %v121_v23 = vsub.s32 4, %v97_v0 }
  0x3f   :  { %v99_v2 = vsub.s32 %v95_v62, %v98_v1  ;;  %v122_v26 = vsel %vm37_vm7, %v121_v23, %v97_v0 }
  0x40   :  { %v124_v29 = vsel %vm36_vm8, 0, %v122_v26 }
  0x41   :  { %v101_v4 = vsub.s32 0, %v99_v2  ;;  %v128_v30 = vadd.s32 3, %v124_v29 }
  0x43   :  { %v165_v5 = vmin.u32 %v101_v4, %v99_v2  ;;  %v129_v31 = vand.u32 3, %v128_v30 }
  0x45   :  { %v103_v7 = vclz %v165_v5  ;;  %vm134_vm9 = vcmp.eq.s32.totalorder %v129_v31, 2  ;;  %vm131_vm10 = vcmp.eq.s32.totalorder %v129_v31, 0  ;;  %vm130_vm11 = vcmp.lt.s32.totalorder %v129_v31, 2 }
  0x47   :  { %v166_v8 = vadd.s32 4294967294, %v103_v7 }
  0x49   :  { %vm167_vm6 = vcmp.lt.s32.totalorder %v166_v8, 0 }
  0x4a   :  { %v106_v11 = vsel %vm167_vm6, 0, %v166_v8 }
  0x4b   :  { %v107_v12 = vsub.s32 32, %v106_v11  ;;  %v108_v13 = vshll.u32 %v99_v2, %v106_v11  ;;  %v111_v15 = vsub.s32 4294967266, %v106_v11 }
  0x4d   :  { %v109_v16 = vshrl.u32 %v91_v10, %v107_v12  ;;  %v112_v17 = vadd.s32 127, %v111_v15 }
  0x4f   :  { %v110_v18 = vor.u32 %v109_v16, %v108_v13  ;;  %v113_v19 = vshll.u32 %v112_v17, 23 }
  0x51   :  { %v114_v20 = vor.u32 4788187, %v113_v19  ;;  %v117_v21 = vcvt.s32.f32 %v110_v18 }
  0x53   :  { %v115_v22 = vand.u32 2147483647, %v114_v20 }
  0x55   :  { %v118_v24 = vmul.f32 %v117_v21, %v115_v22 }
  0x57   :  { %v119_v25 = vxor.u32 2147483648, %v118_v24 }
  0x59   :  { %v120_v27 = vsel %vm37_vm7, %v119_v25, %v118_v24 }
  0x5a   :  { %v123_v28 = vsel %vm36_vm8, %v275_v6, %v120_v27 }
  0x5b   :  { %182 = vcosq.f32 %v123_v28 }
  0x5c   :  { %184 = vsinq.f32 %v123_v28 }
  0x65   :  { %v183_v32 = vpop.eup %182 }
  0x66   :  { %v185_v33 = vpop.eup %184  ;;  %v135_v34 = vxor.u32 2147483648, %v183_v32 }
  0x67   :  { %v132_v35 = vxor.u32 2147483648, %v185_v33 }
  0x68   :  { %v136_v9 = vsel %vm134_vm9, %v135_v34, %v185_v33 }
  0x69   :  { %v133_v36 = vsel %vm131_vm10, %v183_v32, %v132_v35 }
  0x6a   :  { %v137_v37 = vsel %vm130_vm11, %v133_v36, %v136_v9 }
  0x6b   :  { %v138_v38 = vsel %vm127_vm12, nan, %v137_v37 }
  0x6c   :  { %v139_v39 = vmul.f32 %v138_v38, %v138_v38 }
  0x6e   :  { %v146_v40 = vmul.f32 %v281_v14, %v139_v39 }
  0x70   :  { %v147_v41 = vadd.f32 %v146_v40, %v269_v3 }
  0x72   :  { %148 = vst [vmem:[#allocation5] sm:$0xf] %v147_v41 }
  0x73   :  { %219 = shalt.err (!%p216_p12)
}
  0x74   :  { %s220_s26 = scalar_lea.hbm %s314_s2, 64 }
  0x75   :  { %p221_p13 = scmp.ne.s32.totalorder %s314_s2, %s220_s26  ;;  %p224_p0 = scmp.lt.u32.totalorder %s220_s26, %s314_s2 }
  0x77   :  { %p226_p1 = pnand %p224_p0, %p221_p13 }
  0x79   :  { %229 = shalt.err (!%p226_p1)
}
  0x7a   :  { %158 = dma.vmem_to_hbm [thread:$0]  %s156_s1, 64, %s314_s2, [#allocation4]  }
  0x7b   :  { %232 = dma.done.wait [#allocation4], 64  }
  0x7c   :  { %233 = vsyncadd [#allocation4], 4294967232 }
  0x7d   :  { %162 = vsyncpa [#allocation3], 1 }
  0x7e   :  { %163 = vsyncpa [#allocation4], 1 }

</bundles_post_ra>
